<compile_context>
chip_gen: v7x
topology: tpu7x:2x2x1
jax: 0.10.0
libtpu: 0.0.40
codegen_flags: <defaults>
</compile_context>

<pallas_src>
import functools
import math

import jax
import jax.numpy as jnp
from jax.experimental import pallas as pl
from jax.experimental.pallas import tpu as pltpu


_MIN_PALLAS_ELEMS = 64 * 1024      # below this, let XLA fuse the multiply
_MIN_GRID_STEPS = 8                # >= ~4 grid steps per TensorCore on v7x
_MIN_TILE_BYTES = 256 * 1024       # don't shrink tiles below this chasing steps
_LANE_WIDTHS = (2048, 1024, 512, 256, 128)


@functools.lru_cache(maxsize=1)
def _tile_params():
    """(target_tile_bytes, vmem_limit_bytes) gated on the chip's VMEM capacity."""
    try:
        vmem_cap = int(pltpu.get_tpu_info().vmem_capacity_bytes)
    except Exception:
        vmem_cap = None
    if vmem_cap is not None and vmem_cap <= 64 * 1024 * 1024:
        # v7x-class: 64 MiB VMEM / ~3.2 TB/s HBM. Bigger tiles pay off, but keep
        # the double-buffered footprint (3 streams x 2 bufs x tile) << VMEM.
        return 4 * 1024 * 1024, 36 * 1024 * 1024
    if vmem_cap is not None:
        # v5e/v6e-class: 128 MiB physical VMEM. The explicit vmem_limit override
        # matters most on v5e (16 MiB default scoped limit).
        return 6 * 1024 * 1024, 64 * 1024 * 1024
    # Unknown backend (e.g. interpret mode): conservative, fits everywhere.
    return 2 * 1024 * 1024, 48 * 1024 * 1024


def _mult_kernel(v_ref, c_ref, o_ref):
    # Elementwise product of the current tile. jnp broadcasting expands any
    # size-1 dims of the context tile; dtype promotion happens on the tile.
    o_ref[...] = (v_ref[...] * c_ref[...]).astype(o_ref.dtype)


def _effective_target(total_bytes, target_bytes):
    # Aim for the roofline-plateau tile size, but never so big that the grid has
    # fewer than ~_MIN_GRID_STEPS steps (keeps both v7x TensorCores pipelined).
    return min(target_bytes, max(total_bytes // _MIN_GRID_STEPS, _MIN_TILE_BYTES))


def _pick_extent(n, unit_bytes, budget_bytes, align):
    """Block extent along one axis: ~budget_bytes worth of `unit_bytes` units,
    a multiple of `align` (or the full extent `n`), never exceeding n."""
    if n <= align:
        return max(n, 1)
    t = max(1, budget_bytes // max(unit_bytes, 1))
    if t >= n:
        return n
    return max(align, (t // align) * align)


def _as_bsh(x, nshape, B, S, H):
    """View `x` (no broadcast materialization) as (B|1, S|1, H|1) matching the
    normalized output shape (B, S, H)."""
    nd = len(nshape)
    aligned = (1,) * (nd - x.ndim) + x.shape
    h = aligned[-1]
    s = aligned[-2] if nd >= 2 else 1
    lead_x = aligned[:-2]
    lead_out = nshape[:-2]
    if all(d == 1 for d in lead_x):
        b = 1
    elif lead_x == lead_out:
        b = B
    else:
        # Mixed broadcast over leading dims (rare): materialize just this operand.
        return jnp.broadcast_to(x, nshape).reshape(B, S, H)
    return x.reshape(b, s, h)


def _maybe_lane_fold(v3, c3, B, S, H):
    """If H isn't a multiple of 128, fold k rows of S into the lane axis so the
    output stays lane-dense (unmasked vst). Returns (v3, c3, S, H)."""
    if H % 128 == 0:
        return v3, c3, S, H
    k = 128 // math.gcd(H, 128)
    if k <= 1 or S % k != 0:
        return v3, c3, S, H
    if v3.shape[2] != H or c3.shape[2] != H:  # broadcast along H: skip the fold
        return v3, c3, S, H

    def fold(x):
        b, s, _ = x.shape
        if s == S:
            return x.reshape(b, S // k, k * H)
        # s == 1: the same context row multiplies each of the k folded rows, so
        # repeat it along the new lane axis (tiny ~k*H-element HBM cost).
        return jnp.tile(x, (1, 1, k))

    return fold(v3), fold(c3), S // k, k * H


def _mult_2d(v2, c2, rows, lane, out_dtype, target_bytes, vmem_limit):
    itemsize = max(v2.dtype.itemsize, c2.dtype.itemsize, jnp.dtype(out_dtype).itemsize)
    eff = _effective_target(rows * lane * itemsize, target_bytes)
    tr = _pick_extent(rows, lane * itemsize, eff, 8)
    return pl.pallas_call(
        _mult_kernel,
        out_shape=jax.ShapeDtypeStruct((rows, lane), out_dtype),
        grid_spec=pltpu.PrefetchScalarGridSpec(
            num_scalar_prefetch=0,
            grid=(pl.cdiv(rows, tr),),
            in_specs=[pl.BlockSpec((tr, lane), lambda i: (i, 0)),
                      pl.BlockSpec((tr, lane), lambda i: (i, 0))],
            out_specs=pl.BlockSpec((tr, lane), lambda i: (i, 0)),
        ),
        compiler_params=pltpu.CompilerParams(
            dimension_semantics=("parallel",),
            vmem_limit_bytes=vmem_limit,
        ),
    )(v2, c2)


def _mult_3d(v3, c3, B, S, H, out_dtype, target_bytes, vmem_limit):
    itemsize = max(v3.dtype.itemsize, c3.dtype.itemsize, jnp.dtype(out_dtype).itemsize)
    eff = _effective_target(B * S * H * itemsize, target_bytes)

    # Tile the lane (H) axis only when a single row exceeds the budget; th stays
    # a multiple of 128 (or full) so output tiles remain lane-dense.
    if H * itemsize > eff and H % 128 == 0:
        th = min(H, max(128, (eff // (128 * itemsize)) * 128))
    else:
        th = H

    row_bytes = th * itemsize
    slab_bytes = S * row_bytes

    if slab_bytes >= eff or B == 1:
        tb, ts = 1, _pick_extent(S, row_bytes, eff, 8)           # tile S
    else:
        tb, ts = _pick_extent(B, slab_bytes, eff, 1), S          # tile B, full S

    # 3 streams x 2 buffers per tile; bail out to XLA if it can't fit.
    if 6 * tb * ts * th * itemsize > vmem_limit:
        return None

    # S is the innermost grid axis so a broadcast context (s == 1) keeps the same
    # block index across the inner sweep and its DMA is elided.
    grid = (pl.cdiv(B, tb), pl.cdiv(H, th), pl.cdiv(S, ts))

    def spec_for(shape3):
        b_full = shape3[0] == B
        s_full = shape3[1] == S
        h_full = shape3[2] == H
        blk = (tb if b_full else 1, ts if s_full else 1, th if h_full else 1)

        def imap(bi, hi, si, _bf=b_full, _sf=s_full, _hf=h_full):
            return (bi if _bf else 0, si if _sf else 0, hi if _hf else 0)

        return pl.BlockSpec(blk, imap)

    return pl.pallas_call(
        _mult_kernel,
        out_shape=jax.ShapeDtypeStruct((B, S, H), out_dtype),
        grid_spec=pltpu.PrefetchScalarGridSpec(
            num_scalar_prefetch=0,
            grid=grid,
            in_specs=[spec_for(v3.shape), spec_for(c3.shape)],
            out_specs=pl.BlockSpec((tb, ts, th), lambda bi, hi, si: (bi, si, hi)),
        ),
        compiler_params=pltpu.CompilerParams(
            dimension_semantics=("parallel", "parallel", "parallel"),
            vmem_limit_bytes=vmem_limit,
        ),
    )(v3, c3)


def mult(vectors: jax.Array, context: jax.Array) -> jax.Array:
    """Pallas equivalent of `Mult.forward(vectors, context)` (vectors * context)."""
    vectors = jnp.asarray(vectors)
    context = jnp.asarray(context)
    out_shape = jnp.broadcast_shapes(vectors.shape, context.shape)
    # NOTE: uses JAX/NumPy type promotion; matches torch for same-dtype inputs.
    out_dtype = jnp.result_type(vectors, context)
    total = math.prod(out_shape) if out_shape else 1

    # Tiny problems: a Pallas launch (~0.35 us/step) is pure overhead.
    if total < _MIN_PALLAS_ELEMS:
        return vectors * context

    target_bytes, vmem_limit = _tile_params()

    # Fast path: no broadcasting -> flattened, lane-dense 2-D tiles (unmasked
    # stores even when the trailing dim is small / not a multiple of 128).
    if vectors.shape == out_shape and context.shape == out_shape:
        lane = next((l for l in _LANE_WIDTHS if total % l == 0), None)
        if lane is not None:
            rows = total // lane
            out2 = _mult_2d(vectors.reshape(rows, lane), context.reshape(rows, lane),
                            rows, lane, out_dtype, target_bytes, vmem_limit)
            return out2.reshape(out_shape)

    # Broadcast path: normalize output to (B, S, H); each operand becomes a
    # (B|1, S|1, H|1) view without materializing the broadcast.
    nshape = tuple(out_shape) if len(out_shape) >= 2 else (1,) * (2 - len(out_shape)) + tuple(out_shape)
    H = nshape[-1]
    S = nshape[-2]
    lead = nshape[:-2]
    B = math.prod(lead) if lead else 1

    v3 = _as_bsh(vectors, nshape, B, S, H)
    c3 = _as_bsh(context, nshape, B, S, H)

    # (a) Degenerate S: fold batch into S so broadcasting happens over a tileable row axis.
    if S == 1 and B > 1:
        v3 = v3.reshape(1, v3.shape[0], v3.shape[2])
        c3 = c3.reshape(1, c3.shape[0], c3.shape[2])
        B, S = 1, B

    # (b) No broadcast over leading/S axes: collapse B into S (bigger row axis;
    # more shapes become eligible for the lane fold below).
    if (B > 1 and v3.shape[0] == B and c3.shape[0] == B
            and v3.shape[1] == S and c3.shape[1] == S):
        v3 = v3.reshape(1, B * S, v3.shape[2])
        c3 = c3.reshape(1, B * S, c3.shape[2])
        S, B = B * S, 1

    # (c) Lane-dense output when H isn't a multiple of 128.
    v3, c3, S, H = _maybe_lane_fold(v3, c3, B, S, H)

    out3 = _mult_3d(v3, c3, B, S, H, out_dtype, target_bytes, vmem_limit)
    if out3 is None:
        # TODO(synk): extremely wide non-128-aligned rows don't tile cleanly; let XLA fuse it.
        return vectors * context
    return out3.reshape(out_shape)


if __name__ == "__main__":
    key = jax.random.PRNGKey(0)
    k1, k2, k3, k4 = jax.random.split(key, 4)

    # 1) Small shapes implied by the module (per-position vectors, per-batch context).
    #    Handled by the XLA fast path (a Pallas launch would be pure overhead here).
    B, S, H = 2, 8, 32
    vectors = jax.random.normal(k1, (B, S, H), dtype=jnp.float32)
    context = jax.random.normal(k2, (B, 1, H), dtype=jnp.float32)
    out = mult(vectors, context)
    jax.block_until_ready(out)
    ref = vectors * context
    assert out.shape == ref.shape and out.dtype == ref.dtype
    assert jnp.allclose(out, ref, atol=1e-6, rtol=1e-6)

    # 2) Pallas broadcast path, H % 128 == 0 (context stays [B,1,H] in HBM).
    v_b = jax.random.normal(k3, (2, 512, 256), dtype=jnp.float32)
    c_b = jax.random.normal(k4, (2, 1, 256), dtype=jnp.float32)
    o_b = mult(v_b, c_b)
    jax.block_until_ready(o_b)
    assert jnp.allclose(o_b, v_b * c_b, atol=1e-6, rtol=1e-6)

    # 3) Broadcast path with the lane-dense fold (H = 96, not a multiple of 128):
    #    vectors folded to (2, 128, 384), context tiled to (2, 1, 384).
    v_f = jax.random.normal(k1, (2, 512, 96), dtype=jnp.float32)
    c_f = jax.random.normal(k2, (2, 1, 96), dtype=jnp.float32)
    o_f = mult(v_f, c_f)
    jax.block_until_ready(o_f)
    assert jnp.allclose(o_f, v_f * c_f, atol=1e-6, rtol=1e-6)

    # 4) Same-shape case: flattened lane-dense 2-D path (H not a multiple of 128).
    v_eq = jax.random.normal(k3, (4, 512, 96), dtype=jnp.float32)
    c_eq = jax.random.normal(k4, (4, 512, 96), dtype=jnp.float32)
    o_eq = mult(v_eq, c_eq)
    jax.block_until_ready(o_eq)
    assert jnp.allclose(o_eq, v_eq * c_eq, atol=1e-6, rtol=1e-6)

    print("KERNEL_OK")
</pallas_src>

<mosaic_0001>
module attributes {stable_mosaic.version = 11 : i64} {
  func.func @_mult_kernel(%arg0: i32, %arg1: i32, %arg2: i32, %arg3: memref<1x256x256xf32, #tpu.memory_space<vmem>>, %arg4: memref<1x1x256xf32, #tpu.memory_space<vmem>>, %arg5: memref<1x256x256xf32, #tpu.memory_space<vmem>>) attributes {dimension_semantics = [#tpu.dimension_semantics<parallel>, #tpu.dimension_semantics<parallel>, #tpu.dimension_semantics<parallel>], iteration_bounds = array<i64: 2, 1, 2>, scalar_prefetch = 0 : i64, scratch_operands = 0 : i64, tpu.core_type = #tpu.core_type<tc>, window_params = [{transform_indices = @transform_0, window_bounds = array<i64: 1, 256, 256>}, {transform_indices = @transform_1, window_bounds = array<i64: 1, 1, 256>}, {transform_indices = @transform_2, window_bounds = array<i64: 1, 256, 256>}]} {
    %c0 = arith.constant 0 : index
    %c0_0 = arith.constant 0 : index
    %c0_1 = arith.constant 0 : index
    %0 = vector.load %arg3[%c0, %c0_0, %c0_1] : memref<1x256x256xf32, #tpu.memory_space<vmem>>, vector<1x256x256xf32>
    %c0_2 = arith.constant 0 : index
    %c0_3 = arith.constant 0 : index
    %c0_4 = arith.constant 0 : index
    %1 = vector.load %arg4[%c0_2, %c0_3, %c0_4] : memref<1x1x256xf32, #tpu.memory_space<vmem>>, vector<1x1x256xf32>
    %2 = vector.broadcast %1 : vector<1x1x256xf32> to vector<1x256x256xf32>
    %3 = arith.mulf %0, %2 : vector<1x256x256xf32>
    %c0_5 = arith.constant 0 : index
    %c0_6 = arith.constant 0 : index
    %c0_7 = arith.constant 0 : index
    %4 = vector.load %arg5[%c0_5, %c0_6, %c0_7] : memref<1x256x256xf32, #tpu.memory_space<vmem>>, vector<1x256x256xf32>
    tpu.vector_store %arg5[%c0_5, %c0_6, %c0_7], %3 {strides = array<i32>} : memref<1x256x256xf32, #tpu.memory_space<vmem>>, vector<1x256x256xf32>,
    return
  }
  func.func @transform_0(%arg0: i32, %arg1: i32, %arg2: i32) -> (i32, i32, i32) {
    %c0_i32 = arith.constant 0 : i32
    return %arg0, %arg2, %arg1 : i32, i32, i32
  }
  func.func @transform_1(%arg0: i32, %arg1: i32, %arg2: i32) -> (i32, i32, i32) {
    %c0_i32 = arith.constant 0 : i32
    %c0_i32_0 = arith.constant 0 : i32
    return %arg0, %c0_i32, %arg1 : i32, i32, i32
  }
  func.func @transform_2(%arg0: i32, %arg1: i32, %arg2: i32) -> (i32, i32, i32) {
    %c0_i32 = arith.constant 0 : i32
    return %arg0, %arg2, %arg1 : i32, i32, i32
  }
}

</mosaic_0001>

<bundles_post_ra>
// kernel: tpu_custom_call.1
= control target key start
LH: loop header
LB: loop body
LE: loop exit
PB: predicated region body
PF: predicated region fallthrough
CT: control target
= control target key end

     0   :  { %7 = vsyncpa [#allocation3], 0  ;;  %s1450_s0 = inlined_call_operand.hbm [shape: f32[2,512,256], index: 0, kind: input, shape index: {}]   ;;  %s1451_s1 = inlined_call_operand.hbm [shape: f32[2,1,256], index: 1, kind: input, shape index: {}]   ;;  %s1452_s2 = inlined_call_operand.hbm [shape: f32[2,512,256], index: 2, kind: output, shape index: {}]  }
   0x1   :  { %9 = vsyncpa [#allocation3 + $0x1], 0 }
   0x2   :  { %10 = vsyncpa [#allocation6], 0 }
   0x3   :  { %12 = vsyncpa [#allocation6 + $0x1], 0 }
   0x4   :  { %13 = vsyncpa [#allocation4], 0 }
   0x5   :  { %15 = vsyncpa [#allocation4 + $0x1], 0  ;;  %s934_s9 = smov 0   ;;  %s936_s10 = smov 0  }
   0x6   :  { %s938_s11 = smov 0   ;;  %s940_s12 = smov 0  }
   0x7   :  { %s942_s13 = smov 0   ;;  %s944_s14 = smov 0  }
   0x8   :  { %s946_s15 = smov 0   ;;  %s948_s16 = smov 0  }
   0x9   :  { %s950_s17 = smov 0   ;;  %s952_s18 = smov 0  }
   0xa   :  { %s954_s19 = smov 0  }
   0xb LB: > { %s588_s20 = sadd.s32 4294967294, %s910_s19   ;;  %s33_s21 = sadd.s32 1, %s902_s17  ;;  %s910_s19 = sphi %s954_s19, %s21_s19   ;;  %s906_s18 = sphi %s952_s18, %s1495_s18   ;;  %s902_s17 = sphi %s950_s17, %s1494_s17   ;;  %s898_s16 = sphi %s948_s16, %s1493_s16   ;;  %s894_s15 = sphi %s946_s15, %s1492_s15   ;;  %s890_s14 = sphi %s944_s14, %s1491_s14   ;;  %s886_s13 = sphi %s942_s13, %s1490_s13   ;;  %s882_s12 = sphi %s940_s12, %s1489_s12   ;;  %s878_s11 = sphi %s938_s11, %s1488_s11   ;;  %s874_s10 = sphi %s936_s10, %s1487_s10   ;;  %s870_s9 = sphi %s934_s9, %s1486_s9  }
   0xc   : > { %p34_p0 = scmp.ge.s32.totalorder %s33_s21, 2  ;;  %s40_s22 = sadd.s32 1, %s906_s18 }
   0xd   : > { %s51_s23 = sadd.s32 1, %s890_s14  ;;  %p1457_p1 = scmp.ne.s32.totalorder %s890_s14, %s886_s13 }
   0xe   : > { %s1497_s21 = smov (%p34_p0, %s33_s21), 0  ;;  %s1499_s22 = smov (!%p34_p0, %s40_s22), %s906_s18 }
   0xf   : > { %1463 = sst [smem:[#allocation11_spill]] %s1497_s21  ;;  %s45_s24 = ssub.s32 %s902_s17, %s1497_s21 }
  0x10   : > { %p1458_p2 = scmp.eq.s32.totalorder %s910_s19, 0  ;;  %p42_p3 = scmp.ge.s32.totalorder %s1499_s22, 2 }
  0x11   : > { %p1459_p4 = scmp.ne.s32.totalorder %s886_s13, %s882_s12  ;;  %p126_p6 = scmp.eq.s32.totalorder %s588_s20, 3 }
  0x12   : > { %p1008_p5 = por %p1458_p2, %p1457_p1  ;;  %s1501_s22 = smov (%p42_p3, %s1499_s22), 0 }
  0x13   : > { %1465 = sst [smem:[#allocation12_spill]] %s1501_s22  ;;  %p1017_p7 = por %p126_p6, %p1459_p4 }
  0x14   : > { %s1023_s27 = ssub.s32 %s906_s18, %s1501_s22  ;;  %p1456_p8 = scmp.lt.s32.totalorder %s910_s19, 4 }
  0x15   : > { %s1466_s26 = scalar_select %p1017_p7, 1, 0 }
  0x16   : > { %s46_s28 = sor.u32 %s45_s24, %s1023_s27  ;;  %s146_s29 = sand.u32 1, %s890_s14  }
  0x17   : > { %1467 = sst [smem:[#allocation13_spill]] %s1466_s26  ;;  %p49_p9 = scmp.eq.s32.totalorder %s46_s28, 0 }
  0x18   : > { %s591_s30 = sshll.u32 %s146_s29, 9  ;;  %s610_s3 = sshll.u32 %s902_s17, 6 }
  0x19   : > { %s1030_s4 = scalar_select %p49_p9, %s890_s14, %s51_s23  }
  0x1a   : > { %s594_s5 = sshll.u32 %s906_s18, 7  ;;  %s150_s7 = scalar_lea.vmem [#allocation2], %s591_s30 }
  0x1b   : > { %s159_s6 = sadd.s32 %s610_s3, %s594_s5  ;;  %s162_s8 = sshll.u32 %s150_s7, 4  ;;  %s1033_s8 = int_to_ptr.vmem [resolvable:$true] %s162_s8 }
  0x1c   : > { %s595_s20 = sshll.u32 %s159_s6, 7  ;;  %p1044_p10 = pnand %p1456_p8, %p1008_p5 }
  0x1d   : > { %s1038_s26 = scalar_lea.hbm %s1450_s0, %s595_s20  ;;  %s1049_s24 = scalar_lea.sflag [#allocation3], %s146_s29 }
  0x1e   : > { %s724_s28 = scalar_lea.hbm %s1038_s26, 8192  ;;  %p726_p13 = pneg %p1044_p10 }
  0x1f   : > { %p725_p12 = scmp.ne.s32.totalorder %s1038_s26, %s724_s28  ;;  %s729_s25 = scalar_lea.hbm %s1450_s0, 32768 }
  0x20   : > { %p730_p5 = scmp.lt.u32.totalorder %s1038_s26, %s1450_s0  ;;  %p731_p6 = scmp.lt.u32.totalorder %s729_s25, %s724_s28 }
  0x21   : > { %p727_p0 = pnand %p726_p13, %p725_p12  ;;  %p733_p8 = scmp.lt.u32.totalorder %s724_s28, %s1038_s26 }
  0x22   : > { %p732_p9 = por %p731_p6, %p730_p5 }
  0x23   : > { %p728_p3 = pneg %p727_p0 }
  0x24   : > { %p734_p1 = por %p733_p8, %p732_p9 }
  0x26   : > { %p735_p2 = pnand %p734_p1, %p728_p3 }
  0x28   : > { %738 = shalt.err (!%p735_p2)
}
  0x29   : > { %s739_s29 = scalar_lea.vmem %s1033_s8, 8192  ;;  %s912_s5 = smov [#allocation2]  }
  0x2a   : > { %p740_p12 = scmp.ne.s32.totalorder %s1033_s8, %s739_s29  ;;  %s744_s6 = sshll.u32 %s912_s5, 4  ;;  %s745_s6 = int_to_ptr.vmem [resolvable:$false] %s744_s6 }
  0x2b   : > { %s746_s7 = scalar_lea.vmem %s745_s6, 16384  ;;  %p747_p11 = scmp.lt.s32.totalorder %s1033_s8, %s745_s6 }
  0x2c   : > { %p742_p0 = pnand %p740_p12, %p726_p13  ;;  %p748_p5 = scmp.lt.s32.totalorder %s746_s7, %s739_s29 }
  0x2e   : > { %p743_p4 = pneg %p742_p0  ;;  %p749_p6 = por %p748_p5, %p747_p11 }
  0x30   : > { %p750_p8 = pnand %p749_p6, %p743_p4 }
  0x32   : > { %753 = shalt.err (!%p750_p8)
}
  0x33   : > { %s913_s20 = smov 256   ;;  %s914_s28 = smov 16  }
  0x34   : > { %622 = dma.hbm_to_vmem [thread:$0]  (!%p1044_p10), %s1038_s26, 8192, %s1033_s8, %s1049_s24, %s913_s20, %s913_s20, %s914_s28  }
  0x35   : > { %p191_p1 = scmp.lt.s32.totalorder %s910_s19, 5  ;;  %p1469_p2 = scmp.ge.s32.totalorder %s910_s19, 1 }
  0x36   : > { %s587_s22 = sadd.s32 4294967295, %s910_s19   ;;  %p77_p11 = scmp.eq.s32.totalorder %s1023_s27, 0 }
  0x37   : > { %p1080_p4 = pnand %p1469_p2, %p191_p1  ;;  %p65_p13 = scmp.eq.s32.totalorder %s587_s22, 0 }
  0x38   : > { %s79_s25 = sadd.s32 1, %s878_s11  ;;  %p1471_p3 = scmp.ne.s32.totalorder %s886_s13, %s882_s12 }
  0x39   : > { %s1088_s30 = scalar_select %p77_p11, %s878_s11, %s79_s25  }
  0x3a   : > { %p1093_p9 = por %p65_p13, %p1471_p3  ;;  %p86_p10 = scmp.ne.s32.totalorder %s878_s11, %s874_s10 }
  0x3b   : > { %p92_p12 = scmp.ne.s32.totalorder %s874_s10, %s870_s9  ;;  %p120_p0 = scmp.eq.s32.totalorder %s587_s22, 3 }
  0x3c   : > { %s1472_s23 = scalar_select %p1093_p9, 1, 0 }
  0x3d   : > { %p1473_p5 = scmp.eq.s32.totalorder %s910_s19, 0  ;;  %s172_s26 = sand.u32 1, %s878_s11  }
  0x3e   : > { %p1104_p8 = por %p92_p12, %p65_p13  ;;  %p1475_p1 = scmp.ne.s32.totalorder %s890_s14, %s886_s13 }
  0x3f   : > { %p88_p6 = por %p86_p10, %p1473_p5  ;;  %s596_s24 = sshll.u32 %s172_s26, 1 }
  0x40   : > { %s1474_s8 = scalar_select %p1104_p8, 1, 0 }
  0x41   : > { %p1111_p2 = por %p120_p0, %p1475_p1  ;;  %s611_s3 = sshll.u32 %s906_s18, 5 }
  0x42   : > { %s1119_s6 = scalar_lea.hbm %s1451_s1, %s611_s3  ;;  %s176_s9 = scalar_lea.vmem [#allocation5], %s596_s24 }
  0x43   : > { %s1476_s27 = scalar_select %p1111_p2, 1, 0 }
  0x44   : > { %s186_s7 = sshll.u32 %s176_s9, 4  ;;  %p1477_p11 = scmp.lt.s32.totalorder %s910_s19, 4  ;;  %s1121_s7 = int_to_ptr.vmem [resolvable:$true] %s186_s7 }
  0x45   : > { %s173_s28 = scalar_lea.sflag [#allocation6], %s172_s26  ;;  %s754_s22 = scalar_lea.hbm %s1119_s6, 32 }
  0x46   : > { %p1125_p13 = pnand %p1477_p11, %p88_p6  ;;  %p755_p3 = scmp.ne.s32.totalorder %s1119_s6, %s754_s22 }
  0x47   : > { %s759_s3 = scalar_lea.hbm %s1451_s1, 64  ;;  %p760_p5 = scmp.lt.u32.totalorder %s1119_s6, %s1451_s1 }
  0x48   : > { %p756_p10 = pneg %p1125_p13  ;;  %p761_p6 = scmp.lt.u32.totalorder %s759_s3, %s754_s22 }
  0x49   : > { %p763_p11 = scmp.lt.u32.totalorder %s754_s22, %s1119_s6 }
  0x4a   : > { %p757_p12 = pnand %p756_p10, %p755_p3  ;;  %p762_p1 = por %p761_p6, %p760_p5 }
  0x4c   : > { %p758_p0 = pneg %p757_p12  ;;  %p764_p7 = por %p763_p11, %p762_p1 }
  0x4e   : > { %p765_p2 = pnand %p764_p7, %p758_p0 }
  0x50   : > { %768 = shalt.err (!%p765_p2)
}
  0x51   : > { %s769_s26 = scalar_lea.vmem %s1121_s7, 32  ;;  %s915_s9 = smov [#allocation5]  }
  0x52   : > { %p770_p3 = scmp.ne.s32.totalorder %s1121_s7, %s769_s26  ;;  %s774_s25 = sshll.u32 %s915_s9, 4  ;;  %s775_s25 = int_to_ptr.vmem [resolvable:$false] %s774_s25 }
  0x53   : > { %s776_s24 = scalar_lea.vmem %s775_s25, 64  ;;  %p777_p9 = scmp.lt.s32.totalorder %s1121_s7, %s775_s25 }
  0x54   : > { %p772_p12 = pnand %p770_p3, %p756_p10  ;;  %p778_p5 = scmp.lt.s32.totalorder %s776_s24, %s769_s26 }
  0x56   : > { %p773_p8 = pneg %p772_p12  ;;  %p779_p6 = por %p778_p5, %p777_p9 }
  0x58   : > { %p780_p1 = pnand %p779_p6, %p773_p8 }
  0x5a   : > { %783 = shalt.err (!%p780_p1)
}
  0x5b   : > { %625 = dma.hbm_to_vmem [thread:$0]  (!%p1125_p13), %s1119_s6, 32, %s1121_s7, %s173_s28  }
  0x5c   : > { %195 = sbr.rel (%p1080_p4) target bundleno = 160 (0xa0), region = 28  ;;  %s1157_s22 = sand.u32 (!%p1080_p4), 1, %s886_s13  }
  0x5d   : > { %s600_s3 = sshll.u32 (!%p1080_p4), %s1157_s22, 9  ;;  %s198_s29 = scalar_lea.sflag (!%p1080_p4), [#allocation3], %s1157_s22 }
  0x5e   : > { %s1163_s5 = scalar_lea.vmem (!%p1080_p4), [#allocation2], %s600_s3  ;;  %p1479_p7 = scmp.ne.s32.totalorder (!%p1080_p4), %s1472_s23, 0 }
  0x63   : > { %857 = dma.done.wait (%p1479_p7), %s198_s29, 8192  }
  0x64   : > { %859 = vsyncadd (%p1479_p7), %s198_s29, 4294959104  ;;  %s206_s21 = sand.u32 1, %s874_s10   ;;  %p1480_p4 = scmp.ne.s32.totalorder %s1474_s8, 0 }
  0x65   : > { %s601_s6 = sshll.u32 %s206_s21, 1  ;;  %s207_s7 = scalar_lea.sflag [#allocation6], %s206_s21 }
  0x66   : > { %s210_s20 = scalar_lea.vmem [#allocation5], %s601_s6 }
  0x67   : > { %861 = dma.done.wait (%p1480_p4), %s207_s7, 32  }
  0x68   : > { %863 = vsyncadd (%p1480_p4), %s207_s7, 4294967264  ;;  %v307_v0 = vlaneseq  ;;  %v241_v4 = vld [vmem:[%s1163_s5] sm:$0xff]  ;;  %v242_v6 = vld [vmem:[%s1163_s5 + $0x8] sm:$0xff]  ;;  %s1202_s23 = scalar_lea.vmem [#allocation7], %s600_s3  ;;  %s612_s8 = sshll.u32 %s894_s15, 6 }
  0x69   : > { %v305_v5 = vld [vmem:[%s210_s20] sm:$0x3]  ;;  %v243_v9 = vld [vmem:[%s1163_s5 + $0x10] sm:$0xff]  ;;  %v244_v10 = vld [vmem:[%s1163_s5 + $0x18] sm:$0xff]  ;;  %s606_s28 = sshll.u32 %s898_s16, 7  ;;  %s464_s26 = sshll.u32 %s1202_s23, 4  ;;  %s1377_s26 = int_to_ptr.vmem [resolvable:$true] %s464_s26 }
  0x6a   : > { %v308_v1 = vshrl.u32 %v307_v0, 7  ;;  %v245_v11 = vld [vmem:[%s1163_s5 + $0x20] sm:$0xff]  ;;  %v246_v12 = vld [vmem:[%s1163_s5 + $0x28] sm:$0xff]  ;;  %v247_v13 = vld [vmem:[%s1163_s5 + $0x30] sm:$0xff]  ;;  %s1315_s16 = sadd.s32 %s612_s8, %s606_s28  ;;  %s446_s3 = scalar_lea.sflag [#allocation4], %s1157_s22 }
  0x6b   : > { %v248_v14 = vld [vmem:[%s1163_s5 + $0x38] sm:$0xff]  ;;  %v249_v19 = vld [vmem:[%s1163_s5 + $0x40] sm:$0xff]  ;;  %v250_v20 = vld [vmem:[%s1163_s5 + $0x48] sm:$0xff]  ;;  %s607_s15 = sshll.u32 %s1315_s16, 7  ;;  %s784_s29 = scalar_lea.vmem %s1377_s26, 8192 }
  0x6c   : > { %v309_v2 = vsub.s32 0, %v308_v1  ;;  %v313_v3 = vsub.s32 1, %v308_v1  ;;  %v251_v21 = vld [vmem:[%s1163_s5 + $0x50] sm:$0xff]  ;;  %v252_v26 = vld [vmem:[%s1163_s5 + $0x58] sm:$0xff]  ;;  %v253_v27 = vld [vmem:[%s1163_s5 + $0x60] sm:$0xff]  ;;  %s1375_s24 = scalar_lea.hbm %s1452_s2, %s607_s15  ;;  %p785_p9 = scmp.ne.s32.totalorder %s1377_s26, %s784_s29 }
  0x6d   : > { %v254_v28 = vld [vmem:[%s1163_s5 + $0x68] sm:$0xff]  ;;  %v255_v33 = vld [vmem:[%s1163_s5 + $0x70] sm:$0xff]  ;;  %v256_v34 = vld [vmem:[%s1163_s5 + $0x78] sm:$0xff]  ;;  %p1481_p8 = scmp.ne.s32.totalorder %s1476_s27, 0 }
  0x6e   : > { %v1176_v7 = vrot.slane %v305_v5, %v309_v2  ;;  %v1178_v8 = vrot.slane %v305_v5, %v313_v3  ;;  %v257_v35 = vld [vmem:[%s1163_s5 + $0x80] sm:$0xff]  ;;  %v258_v40 = vld [vmem:[%s1163_s5 + $0x88] sm:$0xff]  ;;  %v259_v41 = vld [vmem:[%s1163_s5 + $0x90] sm:$0xff] }
  0x6f   : > { %v260_v42 = vld [vmem:[%s1163_s5 + $0x98] sm:$0xff]  ;;  %v261_v47 = vld [vmem:[%s1163_s5 + $0xa0] sm:$0xff]  ;;  %v262_v48 = vld [vmem:[%s1163_s5 + $0xa8] sm:$0xff]  ;;  %p786_p2 = pnand %p785_p9, %p1481_p8 }
  0x70   : > { %v317_v15 = vmul.f32 %v1176_v7, %v241_v4  ;;  %v318_v16 = vmul.f32 %v1178_v8, %v242_v6  ;;  %v319_v17 = vmul.f32 %v1176_v7, %v243_v9  ;;  %v320_v18 = vmul.f32 %v1178_v8, %v244_v10  ;;  %v263_v49 = vld [vmem:[%s1163_s5 + $0xb0] sm:$0xff]  ;;  %v264_v53 = vld [vmem:[%s1163_s5 + $0xb8] sm:$0xff]  ;;  %v265_v54 = vld [vmem:[%s1163_s5 + $0xc0] sm:$0xff] }
  0x71   : > { %v321_v22 = vmul.f32 %v1176_v7, %v245_v11  ;;  %v322_v23 = vmul.f32 %v1178_v8, %v246_v12  ;;  %v323_v24 = vmul.f32 %v1176_v7, %v247_v13  ;;  %v324_v25 = vmul.f32 %v1178_v8, %v248_v14  ;;  %v266_v55 = vld [vmem:[%s1163_s5 + $0xc8] sm:$0xff]  ;;  %v267_v59 = vld [vmem:[%s1163_s5 + $0xd0] sm:$0xff]  ;;  %v268_v60 = vld [vmem:[%s1163_s5 + $0xd8] sm:$0xff]  ;;  %p787_p13 = pneg %p786_p2 }
  0x72   : > { %381 = vst [vmem:[%s1202_s23] sm:$0xff] %v317_v15  ;;  %382 = vst [vmem:[%s1202_s23 + $0x8] sm:$0xff] %v318_v16  ;;  %v325_v29 = vmul.f32 %v1176_v7, %v249_v19  ;;  %v326_v30 = vmul.f32 %v1178_v8, %v250_v20  ;;  %v327_v31 = vmul.f32 %v1176_v7, %v251_v21  ;;  %v269_v61 = vld [vmem:[%s1163_s5 + $0xe0] sm:$0xff]  ;;  %v270_v1 = vld [vmem:[%s1163_s5 + $0xe8] sm:$0xff] }
  0x73   : > { %383 = vst [vmem:[%s1202_s23 + $0x10] sm:$0xff] %v319_v17  ;;  %384 = vst [vmem:[%s1202_s23 + $0x18] sm:$0xff] %v320_v18  ;;  %v328_v32 = vmul.f32 %v1178_v8, %v252_v26  ;;  %v329_v36 = vmul.f32 %v1176_v7, %v253_v27  ;;  %v330_v37 = vmul.f32 %v1178_v8, %v254_v28  ;;  %v271_v2 = vld [vmem:[%s1163_s5 + $0xf0] sm:$0xff]  ;;  %v272_v3 = vld [vmem:[%s1163_s5 + $0xf8] sm:$0xff] }
  0x74   : > { %385 = vst [vmem:[%s1202_s23 + $0x20] sm:$0xff] %v321_v22  ;;  %386 = vst [vmem:[%s1202_s23 + $0x28] sm:$0xff] %v322_v23  ;;  %v331_v38 = vmul.f32 %v1176_v7, %v255_v33  ;;  %v332_v39 = vmul.f32 %v1178_v8, %v256_v34  ;;  %v333_v43 = vmul.f32 %v1176_v7, %v257_v35  ;;  %v273_v9 = vld [vmem:[%s1163_s5 + $0x100] sm:$0xff]  ;;  %v274_v10 = vld [vmem:[%s1163_s5 + $0x108] sm:$0xff] }
  0x75   : > { %387 = vst [vmem:[%s1202_s23 + $0x30] sm:$0xff] %v323_v24  ;;  %388 = vst [vmem:[%s1202_s23 + $0x38] sm:$0xff] %v324_v25  ;;  %v334_v44 = vmul.f32 %v1178_v8, %v258_v40  ;;  %v335_v45 = vmul.f32 %v1176_v7, %v259_v41  ;;  %v336_v46 = vmul.f32 %v1178_v8, %v260_v42  ;;  %v275_v11 = vld [vmem:[%s1163_s5 + $0x110] sm:$0xff]  ;;  %v276_v15 = vld [vmem:[%s1163_s5 + $0x118] sm:$0xff] }
  0x76   : > { %389 = vst [vmem:[%s1202_s23 + $0x40] sm:$0xff] %v325_v29  ;;  %390 = vst [vmem:[%s1202_s23 + $0x48] sm:$0xff] %v326_v30  ;;  %v337_v50 = vmul.f32 %v1176_v7, %v261_v47  ;;  %v338_v51 = vmul.f32 %v1178_v8, %v262_v48  ;;  %v339_v52 = vmul.f32 %v1176_v7, %v263_v49  ;;  %v277_v16 = vld [vmem:[%s1163_s5 + $0x120] sm:$0xff]  ;;  %v278_v17 = vld [vmem:[%s1163_s5 + $0x128] sm:$0xff] }
  0x77   : > { %391 = vst [vmem:[%s1202_s23 + $0x50] sm:$0xff] %v327_v31  ;;  %392 = vst [vmem:[%s1202_s23 + $0x58] sm:$0xff] %v328_v32  ;;  %v340_v56 = vmul.f32 %v1178_v8, %v264_v53  ;;  %v341_v57 = vmul.f32 %v1176_v7, %v265_v54  ;;  %v342_v58 = vmul.f32 %v1178_v8, %v266_v55  ;;  %v279_v21 = vld [vmem:[%s1163_s5 + $0x130] sm:$0xff]  ;;  %v280_v22 = vld [vmem:[%s1163_s5 + $0x138] sm:$0xff] }
  0x78   : > { %393 = vst [vmem:[%s1202_s23 + $0x60] sm:$0xff] %v329_v36  ;;  %394 = vst [vmem:[%s1202_s23 + $0x68] sm:$0xff] %v330_v37  ;;  %v343_v62 = vmul.f32 %v1176_v7, %v267_v59  ;;  %v344_v63 = vmul.f32 %v1178_v8, %v268_v60  ;;  %v345_v0 = vmul.f32 %v1176_v7, %v269_v61  ;;  %v281_v23 = vld [vmem:[%s1163_s5 + $0x140] sm:$0xff]  ;;  %v282_v27 = vld [vmem:[%s1163_s5 + $0x148] sm:$0xff] }
  0x79   : > { %395 = vst [vmem:[%s1202_s23 + $0x70] sm:$0xff] %v331_v38  ;;  %396 = vst [vmem:[%s1202_s23 + $0x78] sm:$0xff] %v332_v39  ;;  %v346_v4 = vmul.f32 %v1178_v8, %v270_v1  ;;  %v347_v5 = vmul.f32 %v1176_v7, %v271_v2  ;;  %v348_v6 = vmul.f32 %v1178_v8, %v272_v3  ;;  %v283_v28 = vld [vmem:[%s1163_s5 + $0x150] sm:$0xff]  ;;  %v284_v29 = vld [vmem:[%s1163_s5 + $0x158] sm:$0xff] }
  0x7a   : > { %397 = vst [vmem:[%s1202_s23 + $0x80] sm:$0xff] %v333_v43  ;;  %398 = vst [vmem:[%s1202_s23 + $0x88] sm:$0xff] %v334_v44  ;;  %v349_v12 = vmul.f32 %v1176_v7, %v273_v9  ;;  %v350_v13 = vmul.f32 %v1178_v8, %v274_v10  ;;  %v351_v14 = vmul.f32 %v1176_v7, %v275_v11  ;;  %v285_v33 = vld [vmem:[%s1163_s5 + $0x160] sm:$0xff]  ;;  %v286_v34 = vld [vmem:[%s1163_s5 + $0x168] sm:$0xff] }
  0x7b   : > { %399 = vst [vmem:[%s1202_s23 + $0x90] sm:$0xff] %v335_v45  ;;  %400 = vst [vmem:[%s1202_s23 + $0x98] sm:$0xff] %v336_v46  ;;  %v352_v18 = vmul.f32 %v1178_v8, %v276_v15  ;;  %v353_v19 = vmul.f32 %v1176_v7, %v277_v16  ;;  %v354_v20 = vmul.f32 %v1178_v8, %v278_v17  ;;  %v287_v35 = vld [vmem:[%s1163_s5 + $0x170] sm:$0xff]  ;;  %v288_v39 = vld [vmem:[%s1163_s5 + $0x178] sm:$0xff] }
  0x7c   : > { %401 = vst [vmem:[%s1202_s23 + $0xa0] sm:$0xff] %v337_v50  ;;  %402 = vst [vmem:[%s1202_s23 + $0xa8] sm:$0xff] %v338_v51  ;;  %v355_v24 = vmul.f32 %v1176_v7, %v279_v21  ;;  %v356_v25 = vmul.f32 %v1178_v8, %v280_v22  ;;  %v357_v26 = vmul.f32 %v1176_v7, %v281_v23  ;;  %v289_v40 = vld [vmem:[%s1163_s5 + $0x180] sm:$0xff]  ;;  %v290_v41 = vld [vmem:[%s1163_s5 + $0x188] sm:$0xff] }
  0x7d   : > { %403 = vst [vmem:[%s1202_s23 + $0xb0] sm:$0xff] %v339_v52  ;;  %404 = vst [vmem:[%s1202_s23 + $0xb8] sm:$0xff] %v340_v56  ;;  %v358_v30 = vmul.f32 %v1178_v8, %v282_v27  ;;  %v359_v31 = vmul.f32 %v1176_v7, %v283_v28  ;;  %v360_v32 = vmul.f32 %v1178_v8, %v284_v29  ;;  %v291_v45 = vld [vmem:[%s1163_s5 + $0x190] sm:$0xff]  ;;  %v292_v46 = vld [vmem:[%s1163_s5 + $0x198] sm:$0xff] }
  0x7e   : > { %405 = vst [vmem:[%s1202_s23 + $0xc0] sm:$0xff] %v341_v57  ;;  %406 = vst [vmem:[%s1202_s23 + $0xc8] sm:$0xff] %v342_v58  ;;  %v361_v36 = vmul.f32 %v1176_v7, %v285_v33  ;;  %v362_v37 = vmul.f32 %v1178_v8, %v286_v34  ;;  %v363_v38 = vmul.f32 %v1176_v7, %v287_v35  ;;  %v293_v47 = vld [vmem:[%s1163_s5 + $0x1a0] sm:$0xff]  ;;  %v294_v51 = vld [vmem:[%s1163_s5 + $0x1a8] sm:$0xff] }
  0x7f   : > { %407 = vst [vmem:[%s1202_s23 + $0xd0] sm:$0xff] %v343_v62  ;;  %408 = vst [vmem:[%s1202_s23 + $0xd8] sm:$0xff] %v344_v63  ;;  %v364_v42 = vmul.f32 %v1178_v8, %v288_v39  ;;  %v365_v43 = vmul.f32 %v1176_v7, %v289_v40  ;;  %v366_v44 = vmul.f32 %v1178_v8, %v290_v41  ;;  %v295_v52 = vld [vmem:[%s1163_s5 + $0x1b0] sm:$0xff]  ;;  %v296_v53 = vld [vmem:[%s1163_s5 + $0x1b8] sm:$0xff] }
  0x80   : > { %409 = vst [vmem:[%s1202_s23 + $0xe0] sm:$0xff] %v345_v0  ;;  %410 = vst [vmem:[%s1202_s23 + $0xe8] sm:$0xff] %v346_v4  ;;  %v367_v48 = vmul.f32 %v1176_v7, %v291_v45  ;;  %v368_v49 = vmul.f32 %v1178_v8, %v292_v46  ;;  %v369_v50 = vmul.f32 %v1176_v7, %v293_v47  ;;  %v297_v57 = vld [vmem:[%s1163_s5 + $0x1c0] sm:$0xff]  ;;  %v298_v58 = vld [vmem:[%s1163_s5 + $0x1c8] sm:$0xff] }
  0x81   : > { %411 = vst [vmem:[%s1202_s23 + $0xf0] sm:$0xff] %v347_v5  ;;  %412 = vst [vmem:[%s1202_s23 + $0xf8] sm:$0xff] %v348_v6  ;;  %v370_v54 = vmul.f32 %v1178_v8, %v294_v51  ;;  %v371_v55 = vmul.f32 %v1176_v7, %v295_v52  ;;  %v372_v56 = vmul.f32 %v1178_v8, %v296_v53  ;;  %v299_v59 = vld [vmem:[%s1163_s5 + $0x1d0] sm:$0xff]  ;;  %v300_v63 = vld [vmem:[%s1163_s5 + $0x1d8] sm:$0xff] }
  0x82   : > { %413 = vst [vmem:[%s1202_s23 + $0x100] sm:$0xff] %v349_v12  ;;  %414 = vst [vmem:[%s1202_s23 + $0x108] sm:$0xff] %v350_v13  ;;  %v373_v60 = vmul.f32 %v1176_v7, %v297_v57  ;;  %v374_v61 = vmul.f32 %v1178_v8, %v298_v58  ;;  %v375_v62 = vmul.f32 %v1176_v7, %v299_v59  ;;  %v301_v0 = vld [vmem:[%s1163_s5 + $0x1e0] sm:$0xff]  ;;  %v302_v1 = vld [vmem:[%s1163_s5 + $0x1e8] sm:$0xff] }
  0x83   : > { %415 = vst [vmem:[%s1202_s23 + $0x110] sm:$0xff] %v351_v14  ;;  %416 = vst [vmem:[%s1202_s23 + $0x118] sm:$0xff] %v352_v18  ;;  %v376_v2 = vmul.f32 %v1178_v8, %v300_v63  ;;  %v377_v3 = vmul.f32 %v1176_v7, %v301_v0  ;;  %v378_v4 = vmul.f32 %v1178_v8, %v302_v1  ;;  %v303_v5 = vld [vmem:[%s1163_s5 + $0x1f0] sm:$0xff]  ;;  %v304_v6 = vld [vmem:[%s1163_s5 + $0x1f8] sm:$0xff]  ;;  %s916_s5 = smov [#allocation7]  }
  0x84   : > { %417 = vst [vmem:[%s1202_s23 + $0x120] sm:$0xff] %v353_v19  ;;  %418 = vst [vmem:[%s1202_s23 + $0x128] sm:$0xff] %v354_v20  ;;  %v379_v9 = vmul.f32 %v1176_v7, %v303_v5  ;;  %v380_v10 = vmul.f32 %v1178_v8, %v304_v6  ;;  %s788_s21 = sshll.u32 %s916_s5, 4  ;;  %s789_s21 = int_to_ptr.vmem [resolvable:$false] %s788_s21 }
  0x85   : > { %419 = vst [vmem:[%s1202_s23 + $0x130] sm:$0xff] %v355_v24  ;;  %420 = vst [vmem:[%s1202_s23 + $0x138] sm:$0xff] %v356_v25  ;;  %s790_s6 = scalar_lea.vmem %s789_s21, 16384  ;;  %p791_p10 = scmp.lt.s32.totalorder %s1377_s26, %s789_s21 }
  0x86   : > { %421 = vst [vmem:[%s1202_s23 + $0x140] sm:$0xff] %v357_v26  ;;  %422 = vst [vmem:[%s1202_s23 + $0x148] sm:$0xff] %v358_v30  ;;  %p792_p0 = scmp.lt.s32.totalorder %s790_s6, %s784_s29 }
  0x87   : > { %423 = vst [vmem:[%s1202_s23 + $0x150] sm:$0xff] %v359_v31  ;;  %424 = vst [vmem:[%s1202_s23 + $0x158] sm:$0xff] %v360_v32 }
  0x88   : > { %425 = vst [vmem:[%s1202_s23 + $0x160] sm:$0xff] %v361_v36  ;;  %426 = vst [vmem:[%s1202_s23 + $0x168] sm:$0xff] %v362_v37  ;;  %p793_p11 = por %p792_p0, %p791_p10 }
  0x89   : > { %427 = vst [vmem:[%s1202_s23 + $0x170] sm:$0xff] %v363_v38  ;;  %428 = vst [vmem:[%s1202_s23 + $0x178] sm:$0xff] %v364_v42 }
  0x8a   : > { %429 = vst [vmem:[%s1202_s23 + $0x180] sm:$0xff] %v365_v43  ;;  %430 = vst [vmem:[%s1202_s23 + $0x188] sm:$0xff] %v366_v44  ;;  %p794_p3 = pnand %p793_p11, %p787_p13 }
  0x8b   : > { %431 = vst [vmem:[%s1202_s23 + $0x190] sm:$0xff] %v367_v48  ;;  %432 = vst [vmem:[%s1202_s23 + $0x198] sm:$0xff] %v368_v49 }
  0x8c   : > { %433 = vst [vmem:[%s1202_s23 + $0x1a0] sm:$0xff] %v369_v50  ;;  %434 = vst [vmem:[%s1202_s23 + $0x1a8] sm:$0xff] %v370_v54 }
  0x8d   : > { %435 = vst [vmem:[%s1202_s23 + $0x1b0] sm:$0xff] %v371_v55  ;;  %436 = vst [vmem:[%s1202_s23 + $0x1b8] sm:$0xff] %v372_v56 }
  0x8e   : > { %437 = vst [vmem:[%s1202_s23 + $0x1c0] sm:$0xff] %v373_v60  ;;  %438 = vst [vmem:[%s1202_s23 + $0x1c8] sm:$0xff] %v374_v61 }
  0x8f   : > { %439 = vst [vmem:[%s1202_s23 + $0x1d0] sm:$0xff] %v375_v62  ;;  %440 = vst [vmem:[%s1202_s23 + $0x1d8] sm:$0xff] %v376_v2 }
  0x90   : > { %441 = vst [vmem:[%s1202_s23 + $0x1e0] sm:$0xff] %v377_v3  ;;  %442 = vst [vmem:[%s1202_s23 + $0x1e8] sm:$0xff] %v378_v4 }
  0x91   : > { %443 = vst [vmem:[%s1202_s23 + $0x1f0] sm:$0xff] %v379_v9  ;;  %444 = vst [vmem:[%s1202_s23 + $0x1f8] sm:$0xff] %v380_v10 }
  0x92   : > { %797 = shalt.err (!%p794_p3)
}
  0x93   : > { %s798_s7 = scalar_lea.hbm %s1375_s24, 8192  ;;  %s802_s8 = scalar_lea.hbm %s1452_s2, 32768 }
  0x94   : > { %p799_p12 = scmp.ne.s32.totalorder %s1375_s24, %s798_s7  ;;  %p803_p1 = scmp.lt.u32.totalorder %s1375_s24, %s1452_s2 }
  0x95   : > { %p804_p7 = scmp.lt.u32.totalorder %s802_s8, %s798_s7  ;;  %p806_p9 = scmp.lt.u32.totalorder %s798_s7, %s1375_s24 }
  0x96   : > { %p800_p5 = pnand %p799_p12, %p1481_p8 }
  0x97   : > { %p805_p4 = por %p804_p7, %p803_p1 }
  0x98   : > { %p801_p6 = pneg %p800_p5 }
  0x99   : > { %p807_p2 = por %p806_p9, %p805_p4 }
  0x9b   : > { %p808_p13 = pnand %p807_p2, %p801_p6 }
  0x9d   : > { %811 = shalt.err (!%p808_p13)
}
  0x9e   : > { %s917_s15 = smov 256   ;;  %s918_s9 = smov 16  }
  0x9f   : > { %617 = dma.vmem_to_hbm [thread:$0]  (%p1481_p8), %s1377_s26, 8192, %s1375_s24, %s446_s3, %s917_s15, %s917_s15, %s918_s9  }
  0xa0 PF: > { %s1482_s25 = sld [smem:[#allocation13_spill]]  ;;  %p631_p10 = scmp.ge.s32.totalorder %s910_s19, 2 }
  0xa1   : > { %s479_s29 = sand.u32 1, %s882_s12  }
  0xa2   : > { %s480_s5 = scalar_lea.sflag [#allocation4], %s479_s29 }
  0xa6   : > { %p1483_p0 = scmp.ne.s32.totalorder %s1482_s25, 0 }
  0xa8   : > { %p627_p11 = pnand %p631_p10, %p1483_p0 }
  0xaa   : > { %865 = dma.done.wait (!%p627_p11), %s480_s5, 8192  }
  0xab   : > { %867 = vsyncadd (!%p627_p11), %s480_s5, 4294959104  ;;  %s21_s19 = sadd.s32 1, %s910_s19   ;;  %s1484_s27 = sld [smem:[#allocation11_spill]] }
  0xac   : > { %p18_p3 = scmp.ge.s32.totalorder %s21_s19, 6   ;;  %s1485_s22 = sld [smem:[#allocation12_spill]] }
  0xad   : > { %s1486_s9 = smov %s874_s10  ;;  %s1487_s10 = smov %s878_s11 }
  0xae   : > { %s1488_s11 = smov %s1088_s30  ;;  %s1489_s12 = smov %s886_s13 }
  0xaf   : > { %s1490_s13 = smov %s890_s14  ;;  %s1491_s14 = smov %s1030_s4 }
  0xb0   : > { %s1492_s15 = smov %s902_s17  ;;  %s1493_s16 = smov %s906_s18 }
  0xb1   : > { %s1494_s17 = smov %s1484_s27  ;;  %20 = sbr.rel (!%p18_p3) target bundleno = 11 (0xb), region = 86 }
  0xb2   : > { %s1495_s18 = smov %s1485_s22 }
  0xb8   :  { %485 = vsyncpa [#allocation3], 1 }
  0xb9   :  { %487 = vsyncpa [#allocation3 + $0x1], 1 }
  0xba   :  { %488 = vsyncpa [#allocation6], 1 }
  0xbb   :  { %490 = vsyncpa [#allocation6 + $0x1], 1 }
  0xbc   :  { %491 = vsyncpa [#allocation4], 1 }
  0xbd   :  { %493 = vsyncpa [#allocation4 + $0x1], 1 }

</bundles_post_ra>
